<compile_context>
chip_gen: v7x
topology: tpu7x:2x2x1
jax: 0.10.0
libtpu: 0.0.40
codegen_flags: <defaults>
</compile_context>

<pallas_src>
import functools

import jax
import jax.numpy as jnp
from jax.experimental import pallas as pl
from jax.experimental.pallas import tpu as pltpu

MARGIN = 10.0          # module default
_LANES = 128           # vreg lane width
_SUBLANES = 8          # vreg sublane count
_PAD_POS = -1.0e30     # pad value for `positive`: max(0, pad - 0 + margin) == 0


def _margin_pairwise_loss_kernel(pos_ref, neg_ref, out_ref, *, margin):
    i = pl.program_id(0)

    @pl.when(i == 0)
    def _init():
        out_ref[0, 0] = jnp.float32(0.0)

    p = pos_ref[...].astype(jnp.float32)
    n = neg_ref[...].astype(jnp.float32)
    hinge = jnp.maximum(p - n + jnp.float32(margin), 0.0)
    out_ref[0, 0] = out_ref[0, 0] + jnp.sum(hinge)


def margin_pairwise_loss(positive, negative, margin=MARGIN, block_rows_max=2048):
    """loss = sum(max(0, positive - negative + margin)). Returns scalar f32."""
    assert positive.shape == negative.shape, (positive.shape, negative.shape)
    assert block_rows_max % _SUBLANES == 0

    pos = jnp.ravel(positive)
    neg = jnp.ravel(negative)
    n_elems = pos.shape[0]

    # Lane-dense 2D layout: (rows, 128); rows padded to a multiple of the
    # row-block so every grid block is a full (block_rows, 128) tile.
    rows = -(-n_elems // _LANES)
    block_rows = min(block_rows_max, -(-rows // _SUBLANES) * _SUBLANES)
    padded_rows = -(-rows // block_rows) * block_rows
    padded = padded_rows * _LANES
    if padded != n_elems:
        pos = jnp.pad(pos, (0, padded - n_elems), constant_values=_PAD_POS)
        neg = jnp.pad(neg, (0, padded - n_elems), constant_values=0.0)
    pos2 = pos.reshape(padded_rows, _LANES)
    neg2 = neg.reshape(padded_rows, _LANES)
    num_blocks = padded_rows // block_rows

    out = pl.pallas_call(
        functools.partial(_margin_pairwise_loss_kernel, margin=float(margin)),
        out_shape=jax.ShapeDtypeStruct((1, 1), jnp.float32),
        grid_spec=pltpu.PrefetchScalarGridSpec(
            num_scalar_prefetch=0,
            grid=(num_blocks,),
            in_specs=[
                pl.BlockSpec((block_rows, _LANES), lambda i: (i, 0)),
                pl.BlockSpec((block_rows, _LANES), lambda i: (i, 0)),
            ],
            # Scalar result leaves through SMEM (no padded VMEM tile).
            out_specs=pl.BlockSpec(memory_space=pltpu.MemorySpace.SMEM),
        ),
        compiler_params=pltpu.CompilerParams(
            dimension_semantics=("arbitrary",)),
    )(pos2, neg2)
    return out[0, 0]


def _reference(positive, negative, margin=MARGIN):
    # Pure-JAX reference of the PyTorch forward.
    diff = positive.astype(jnp.float32) - negative.astype(jnp.float32) + margin
    return jnp.sum(jnp.maximum(diff, 0.0))


if __name__ == "__main__":
    key = jax.random.PRNGKey(0)
    k1, k2, k3, k4, k5, k6 = jax.random.split(key, 6)

    # Main case: (8, 128) score tensors -> single (8, 128) block, grid = 1.
    pos_a = jax.random.normal(k1, (8, 128), dtype=jnp.float32)
    neg_a = jax.random.normal(k2, (8, 128), dtype=jnp.float32)
    loss_a = jax.block_until_ready(margin_pairwise_loss(pos_a, neg_a))
    ref_a = _reference(pos_a, neg_a)
    assert jnp.allclose(loss_a, ref_a, rtol=1e-5, atol=1e-3), (loss_a, ref_a)

    # Multi-block case: force grid = 2 to exercise SMEM accumulation across steps.
    pos_b = jax.random.normal(k3, (4, 8, 64), dtype=jnp.float32)
    neg_b = jax.random.normal(k4, (4, 8, 64), dtype=jnp.float32)
    loss_b = jax.block_until_ready(
        margin_pairwise_loss(pos_b, neg_b, block_rows_max=8))
    ref_b = _reference(pos_b, neg_b)
    assert jnp.allclose(loss_b, ref_b, rtol=1e-5, atol=1e-3), (loss_b, ref_b)

    # Ragged case: element count not a multiple of 128 -> exercises padding.
    pos_c = jax.random.normal(k5, (3, 50), dtype=jnp.float32)
    neg_c = jax.random.normal(k6, (3, 50), dtype=jnp.float32)
    loss_c = jax.block_until_ready(margin_pairwise_loss(pos_c, neg_c))
    ref_c = _reference(pos_c, neg_c)
    assert jnp.allclose(loss_c, ref_c, rtol=1e-5, atol=1e-3), (loss_c, ref_c)

    print("KERNEL_OK")
</pallas_src>

<mosaic_0001>
module attributes {stable_mosaic.version = 11 : i64} {
  func.func @_margin_pairwise_loss_kernel(%arg0: i32, %arg1: memref<8x128xf32, #tpu.memory_space<vmem>>, %arg2: memref<8x128xf32, #tpu.memory_space<vmem>>, %arg3: memref<1x1xf32, #tpu.memory_space<smem>>) attributes {dimension_semantics = [#tpu.dimension_semantics<arbitrary>], iteration_bounds = array<i64: 1>, scalar_prefetch = 0 : i64, scratch_operands = 0 : i64, tpu.core_type = #tpu.core_type<tc>, window_params = [{transform_indices = @transform_0, window_bounds = array<i64: 8, 128>}, {transform_indices = @transform_1, window_bounds = array<i64: 8, 128>}, {transform_indices = @transform_2, window_bounds = array<i64: 1, 1>}]} {
    %c0_i32 = arith.constant 0 : i32
    %0 = arith.cmpi eq, %arg0, %c0_i32 : i32
    %1 = arith.extui %0 : i1 to i32
    %c0_i32_0 = arith.constant 0 : i32
    %2 = arith.cmpi ne, %1, %c0_i32_0 : i32
    scf.if %2 {
      %cst_10 = arith.constant 0.000000e+00 : f32
      %c0_11 = arith.constant 0 : index
      %c0_12 = arith.constant 0 : index
      %17 = memref.load %arg3[%c0_11, %c0_12] : memref<1x1xf32, #tpu.memory_space<smem>>
      memref.store %cst_10, %arg3[%c0_11, %c0_12] : memref<1x1xf32, #tpu.memory_space<smem>>
    } else {
    }
    %c0 = arith.constant 0 : index
    %c0_1 = arith.constant 0 : index
    %3 = vector.load %arg1[%c0, %c0_1] : memref<8x128xf32, #tpu.memory_space<vmem>>, vector<8x128xf32>
    %c0_2 = arith.constant 0 : index
    %c0_3 = arith.constant 0 : index
    %4 = vector.load %arg2[%c0_2, %c0_3] : memref<8x128xf32, #tpu.memory_space<vmem>>, vector<8x128xf32>
    %5 = arith.subf %3, %4 : vector<8x128xf32>
    %cst = arith.constant 1.000000e+01 : f32
    %6 = vector.broadcast %cst : f32 to vector<8x128xf32>
    %7 = arith.addf %5, %6 : vector<8x128xf32>
    %cst_4 = arith.constant 0.000000e+00 : f32
    %8 = vector.broadcast %cst_4 : f32 to vector<8x128xf32>
    %9 = arith.maximumf %7, %8 : vector<8x128xf32>
    %c0_5 = arith.constant 0 : index
    %c0_6 = arith.constant 0 : index
    %10 = memref.load %arg3[%c0_5, %c0_6] : memref<1x1xf32, #tpu.memory_space<smem>>
    %11 = vector.shape_cast %9 : vector<8x128xf32> to vector<1x8x128xf32>
    %cst_7 = arith.constant dense<0.000000e+00> : vector<1xf32>
    %12 = vector.multi_reduction <add>, %11, %cst_7 [1, 2] : vector<1x8x128xf32> to vector<1xf32>
    %13 = vector.shape_cast %12 : vector<1xf32> to vector<1x1x1xf32>
    %14 = vector.extract %13[0, 0, 0] : f32 from vector<1x1x1xf32>
    %15 = arith.addf %10, %14 : f32
    %c0_8 = arith.constant 0 : index
    %c0_9 = arith.constant 0 : index
    %16 = memref.load %arg3[%c0_8, %c0_9] : memref<1x1xf32, #tpu.memory_space<smem>>
    memref.store %15, %arg3[%c0_8, %c0_9] : memref<1x1xf32, #tpu.memory_space<smem>>
    return
  }
  func.func @transform_0(%arg0: i32) -> (i32, i32) {
    %c0_i32 = arith.constant 0 : i32
    %c0_i32_0 = arith.constant 0 : i32
    return %arg0, %c0_i32 : i32, i32
  }
  func.func @transform_1(%arg0: i32) -> (i32, i32) {
    %c0_i32 = arith.constant 0 : i32
    %c0_i32_0 = arith.constant 0 : i32
    return %arg0, %c0_i32 : i32, i32
  }
  func.func @transform_2(%arg0: i32) -> (i32, i32) {
    %c0_i32 = arith.constant 0 : i32
    %c0_i32_0 = arith.constant 0 : i32
    %c0_i32_1 = arith.constant 0 : i32
    return %c0_i32, %c0_i32_0 : i32, i32
  }
}

</mosaic_0001>

<bundles_post_ra>
// kernel: tpu_custom_call.1
= control target key start
LH: loop header
LB: loop body
LE: loop exit
PB: predicated region body
PF: predicated region fallthrough
CT: control target
= control target key end

     0   :  { %7 = vsyncpa [#allocation3], 0  ;;  %s195_s0 = inlined_call_operand.hbm [shape: f32[8,128], index: 0, kind: input, shape index: {}]   ;;  %s196_s1 = inlined_call_operand.hbm [shape: f32[8,128], index: 1, kind: input, shape index: {}]   ;;  %s197_s2 = inlined_call_operand.hbm [shape: f32[1,1], index: 2, kind: output, shape index: {}]  }
   0x1   :  { %8 = vsyncpa [#allocation6], 0 }
   0x2   :  { %9 = vsyncpa [#allocation4], 0  ;;  %s141_s9 = smov [#allocation2]   ;;  %s142_s11 = smov [#allocation5]  }
   0x3   :  { %s16_s10 = sshll.u32 %s141_s9, 4  ;;  %s26_s12 = sshll.u32 %s142_s11, 4  ;;  %s17_s10 = int_to_ptr.vmem [resolvable:$true] %s16_s10  ;;  %s27_s12 = int_to_ptr.vmem [resolvable:$true] %s26_s12 }
   0x4   :  { %s81_s15 = scalar_lea.hbm %s195_s0, 128 }
   0x5   :  { %p82_p0 = scmp.ne.s32.totalorder %s195_s0, %s81_s15  ;;  %p85_p1 = scmp.lt.u32.totalorder %s81_s15, %s195_s0 }
   0x7   :  { %p87_p2 = pnand %p85_p1, %p82_p0 }
   0x9   :  { %90 = shalt.err (!%p87_p2)
}
   0xa   :  { %s91_s20 = scalar_lea.vmem %s17_s10, 128  ;;  %p96_p4 = scmp.lt.s32.totalorder %s17_s10, %s17_s10 }
   0xb   :  { %p92_p3 = scmp.ne.s32.totalorder %s17_s10, %s91_s20  ;;  %p97_p5 = scmp.lt.s32.totalorder %s91_s20, %s91_s20 }
   0xd   :  { %p98_p6 = por %p97_p5, %p96_p4 }
   0xf   :  { %p99_p7 = pnand %p98_p6, %p92_p3 }
  0x11   :  { %102 = shalt.err (!%p99_p7)
}
  0x12   :  { %19 = dma.hbm_to_vmem [thread:$0]  %s195_s0, 128, %s17_s10, [#allocation3]  }
  0x13   :  { %s103_s25 = scalar_lea.hbm %s196_s1, 128 }
  0x14   :  { %p104_p8 = scmp.ne.s32.totalorder %s196_s1, %s103_s25  ;;  %p107_p9 = scmp.lt.u32.totalorder %s103_s25, %s196_s1 }
  0x16   :  { %p109_p10 = pnand %p107_p9, %p104_p8 }
  0x18   :  { %112 = shalt.err (!%p109_p10)
}
  0x19   :  { %s113_s30 = scalar_lea.vmem %s27_s12, 128  ;;  %p118_p12 = scmp.lt.s32.totalorder %s27_s12, %s27_s12 }
  0x1a   :  { %p114_p11 = scmp.ne.s32.totalorder %s27_s12, %s113_s30  ;;  %p119_p13 = scmp.lt.s32.totalorder %s113_s30, %s113_s30 }
  0x1c   :  { %p120_p0 = por %p119_p13, %p118_p12 }
  0x1e   :  { %p121_p1 = pnand %p120_p0, %p114_p11 }
  0x20   :  { %124 = shalt.err (!%p121_p1)
}
  0x21   :  { %29 = dma.hbm_to_vmem [thread:$0]  %s196_s1, 128, %s27_s12, [#allocation6]  }
  0x22   :  { %135 = dma.done.wait [#allocation3], 128  }
  0x23   :  { %136 = vsyncadd [#allocation3], 4294967168 }
  0x24   :  { %137 = dma.done.wait [#allocation6], 128  }
  0x25   :  { %138 = vsyncadd [#allocation6], 4294967168  ;;  %v42_v0 = vld [vmem:[#allocation2] sm:$0xff]  ;;  %v43_v1 = vld [vmem:[#allocation5] sm:$0xff]  ;;  %s125_s6 = scalar_lea.hbm %s197_s2, 16 }
  0x26   :  { %v44_v2 = vsub.f32 %v42_v0, %v43_v1  ;;  %p126_p2 = scmp.ne.s32.totalorder %s197_s2, %s125_s6  ;;  %p129_p3 = scmp.lt.u32.totalorder %s125_s6, %s197_s2 }
  0x28   :  { %v45_v3 = vadd.f32 10.0, %v44_v2  ;;  %p131_p4 = pnand %p129_p3, %p126_p2 }
  0x2a   :  { %v46_v4 = vmax.f32 %v45_v3, 0.0 }
  0x2c   :  { %48 = vadd.xlane.f32.xlu0 %v46_v4 }
  0xb9   :  { %v49_v5 = vpop.xlane.xlu0 %48 }
  0xba   :  { %v50_v6 = vrot.slane %v49_v5, 4 }
  0xbc   :  { %v51_v7 = vadd.f32 %v50_v6, %v49_v5 }
  0xbe   :  { %v52_v8 = vrot.slane %v51_v7, 2 }
  0xc0   :  { %v53_v9 = vadd.f32 %v52_v8, %v51_v7 }
  0xc2   :  { %v54_v10 = vrot.slane %v53_v9, 1 }
  0xc4   :  { %v55_v11 = vadd.f32 %v54_v10, %v53_v9 }
  0xc6   :  { %75 = vpush %v55_v11 }
  0xf7   :  { %s76_s4 = spop %75 }
  0xf8   :  { %59 = sst [smem:[#allocation7]] %s76_s4 }
  0xf9   :  { %134 = shalt.err (!%p131_p4)
}
  0xfa   :  { %s143_s11 = smov [#allocation7]  }
  0xfb   :  { %67 = dma.smem_to_hbm %s143_s11, 16, %s197_s2, [#allocation4]  }
  0xfc   :  { %139 = dma.done.wait [#allocation4], 16  }
  0xfd   :  { %140 = vsyncadd [#allocation4], 4294967280 }
  0xfe   :  { %71 = sfence }
  0xff   :  { %72 = vsyncpa [#allocation3], 1 }
 0x100   :  { %73 = vsyncpa [#allocation6], 1 }
 0x101   :  { %74 = vsyncpa [#allocation4], 1 }

</bundles_post_ra>
